<compile_context>
chip_gen: v5e
topology: v5e:2x2
jax: 0.10.0
libtpu: 0.0.40
codegen_flags: <defaults>
</compile_context>

<pallas_src>
import functools

import jax
import jax.numpy as jnp
from jax import lax
from jax.experimental import pallas as pl
from jax.experimental.pallas import tpu as pltpu

LANES = 128    # lane width (last dim of every block)
MAX_TM = 1024  # max sublane rows per block: (1024,128) f32 = 512 KiB per input
NCORES = 2     # leading "parallel" grid axis -> 2 TensorCores on v7x


def _iou_sums_kernel(p_ref, t_ref, tp_ref, st_ref, sp_ref, *,
                     tm, rows, tiles_per_core, need_mask):
    """Accumulate sum(T*P), sum(T), sum(P) into per-core (1,1,128) f32 partials."""
    c = pl.program_id(0)   # core-split axis ("parallel")
    i = pl.program_id(1)   # row-tile axis within this core ("arbitrary" / reduction)

    @pl.when(i == 0)
    def _init():
        tp_ref[...] = jnp.zeros_like(tp_ref)
        st_ref[...] = jnp.zeros_like(st_ref)
        sp_ref[...] = jnp.zeros_like(sp_ref)

    p = p_ref[...].astype(jnp.float32)   # cast to f32 for accumulation only
    t = t_ref[...].astype(jnp.float32)

    def _sumrows(x):
        # (tm, 128) -> (1, 1, 128): reduce sublanes only; lane reduce happens
        # once, in the wrapper.
        return jnp.sum(x, axis=0, keepdims=True)[None]

    def _accumulate(tv, pv):
        tp_ref[...] += _sumrows(tv * pv)
        st_ref[...] += _sumrows(tv)
        sp_ref[...] += _sumrows(pv)

    if need_mask:
        # Logical (unclamped) block index of this step; rows >= `rows` are
        # garbage (ragged tail / core-split over-coverage) and must not count.
        b = c * tiles_per_core + i
        is_edge = (b + 1) * tm > rows

        @pl.when(jnp.logical_not(is_edge))
        def _full():
            _accumulate(t, p)

        @pl.when(is_edge)
        def _edge():
            row = b * tm + lax.broadcasted_iota(jnp.int32, (tm, LANES), 0)
            valid = row < rows
            _accumulate(jnp.where(valid, t, 0.0), jnp.where(valid, p, 0.0))
    else:
        _accumulate(t, p)


def mean_iou_binary(y_pred, y_true, smooth=1e-05, n_classes=13):
    """Pallas TPU implementation of MeanIoUBinary.forward (n_classes unused, as in torch)."""
    assert y_true.shape == y_pred.shape, f"{y_true.shape} != {y_pred.shape}"
    del n_classes
    smooth = float(smooth)

    # Flatten in native dtype (bf16 inputs are read as bf16: half the HBM traffic).
    p_flat = jnp.ravel(y_pred)
    t_flat = jnp.ravel(y_true)
    n = p_flat.shape[0]

    n_main = (n // LANES) * LANES   # lane-aligned prefix handled by the kernel
    rows = n_main // LANES

    if rows < 8:
        # Degenerate tiny input (< 1024 elements): nothing worth launching a kernel for.
        tf = t_flat.astype(jnp.float32)
        pf = p_flat.astype(jnp.float32)
        tp, st, sp = jnp.sum(tf * pf), jnp.sum(tf), jnp.sum(pf)
    else:
        # No-op slice+reshape when n % 128 == 0 (the common case): zero extra copies.
        p2 = p_flat[:n_main].reshape(rows, LANES)
        t2 = t_flat[:n_main].reshape(rows, LANES)

        # Large row tile (multiple of 8, never larger than the array).
        tm = MAX_TM if rows >= MAX_TM else max(8, (rows // 8) * 8)
        num_tiles = (rows + tm - 1) // tm
        tiles_per_core = (num_tiles + NCORES - 1) // NCORES
        need_mask = (NCORES * tiles_per_core * tm != rows)

        def in_map(c, i):
            # Clamp so over-coverage steps (uneven core split / ragged last tile)
            # never DMA out of bounds; their contribution is masked to zero.
            return (jnp.minimum(c * tiles_per_core + i, num_tiles - 1), 0)

        part_shape = jax.ShapeDtypeStruct((NCORES, 1, LANES), jnp.float32)
        out_block = lambda: pl.BlockSpec((1, 1, LANES), lambda c, i: (c, 0, 0))

        kernel = functools.partial(
            _iou_sums_kernel, tm=tm, rows=rows,
            tiles_per_core=tiles_per_core, need_mask=need_mask)

        tp_p, st_p, sp_p = pl.pallas_call(
            kernel,
            out_shape=(part_shape, part_shape, part_shape),
            grid_spec=pltpu.PrefetchScalarGridSpec(
                num_scalar_prefetch=0,
                grid=(NCORES, tiles_per_core),
                in_specs=[
                    pl.BlockSpec((tm, LANES), in_map),
                    pl.BlockSpec((tm, LANES), in_map),
                ],
                out_specs=[out_block(), out_block(), out_block()],
            ),
            compiler_params=pltpu.CompilerParams(
                dimension_semantics=("parallel", "arbitrary")),
        )(p2, t2)

        tp, st, sp = jnp.sum(tp_p), jnp.sum(st_p), jnp.sum(sp_p)

    if n_main < n:  # ragged lane tail (< 128 elements), no padding copy needed
        pt = p_flat[n_main:].astype(jnp.float32)
        tt = t_flat[n_main:].astype(jnp.float32)
        tp = tp + jnp.sum(tt * pt)
        st = st + jnp.sum(tt)
        sp = sp + jnp.sum(pt)

    # TP + FN + FP == sum(T) + sum(P) - TP
    return (tp + smooth) / (st + sp - tp + smooth)


if __name__ == "__main__":
    key = jax.random.PRNGKey(0)
    kp, kt = jax.random.split(key)
    # Small shapes consistent with a segmentation use-case (N, C, H, W).
    y_pred = jax.nn.sigmoid(jax.random.normal(kp, (2, 4, 16, 16), jnp.float32))
    y_true = (jax.random.uniform(kt, (2, 4, 16, 16)) > 0.5).astype(jnp.float32)

    iou = jax.block_until_ready(mean_iou_binary(y_pred, y_true))

    # Reference in plain JAX, matching the PyTorch module exactly.
    T = y_true.ravel().astype(jnp.float32)
    P = y_pred.ravel().astype(jnp.float32)
    TP = jnp.sum(T * P)
    FN = jnp.sum(T * (1.0 - P))
    FP = jnp.sum((1.0 - T) * P)
    ref = (TP + 1e-05) / (TP + FN + FP + 1e-05)
    assert jnp.allclose(iou, ref, rtol=1e-5, atol=1e-6), (iou, ref)

    print("KERNEL_OK")
</pallas_src>

<mosaic_0001>
module attributes {stable_mosaic.version = 11 : i64} {
  func.func @_iou_sums_kernel(%arg0: i32, %arg1: i32, %arg2: memref<16x128xf32, #tpu.memory_space<vmem>>, %arg3: memref<16x128xf32, #tpu.memory_space<vmem>>, %arg4: memref<1x1x128xf32, #tpu.memory_space<vmem>>, %arg5: memref<1x1x128xf32, #tpu.memory_space<vmem>>, %arg6: memref<1x1x128xf32, #tpu.memory_space<vmem>>) attributes {dimension_semantics = [#tpu.dimension_semantics<parallel>, #tpu.dimension_semantics<arbitrary>], iteration_bounds = array<i64: 2, 1>, scalar_prefetch = 0 : i64, scratch_operands = 0 : i64, tpu.core_type = #tpu.core_type<tc>, window_params = [{transform_indices = @transform_0, window_bounds = array<i64: 16, 128>}, {transform_indices = @transform_1, window_bounds = array<i64: 16, 128>}, {transform_indices = @transform_2, window_bounds = array<i64: 1, 1, 128>}, {transform_indices = @transform_3, window_bounds = array<i64: 1, 1, 128>}, {transform_indices = @transform_4, window_bounds = array<i64: 1, 1, 128>}]} {
    %c0_i32 = arith.constant 0 : i32
    %0 = arith.cmpi eq, %arg1, %c0_i32 : i32
    %1 = arith.extui %0 : i1 to i32
    %c0_i32_0 = arith.constant 0 : i32
    %2 = arith.cmpi ne, %1, %c0_i32_0 : i32
    scf.if %2 {
      %cst = arith.constant 0.000000e+00 : f32
      %15 = vector.broadcast %cst : f32 to vector<1x1x128xf32>
      %c0_8 = arith.constant 0 : index
      %c0_9 = arith.constant 0 : index
      %c0_10 = arith.constant 0 : index
      %16 = vector.load %arg4[%c0_8, %c0_9, %c0_10] : memref<1x1x128xf32, #tpu.memory_space<vmem>>, vector<1x1x128xf32>
      tpu.vector_store %arg4[%c0_8, %c0_9, %c0_10], %15 {strides = array<i32>} : memref<1x1x128xf32, #tpu.memory_space<vmem>>, vector<1x1x128xf32>,
      %cst_11 = arith.constant 0.000000e+00 : f32
      %17 = vector.broadcast %cst_11 : f32 to vector<1x1x128xf32>
      %c0_12 = arith.constant 0 : index
      %c0_13 = arith.constant 0 : index
      %c0_14 = arith.constant 0 : index
      %18 = vector.load %arg5[%c0_12, %c0_13, %c0_14] : memref<1x1x128xf32, #tpu.memory_space<vmem>>, vector<1x1x128xf32>
      tpu.vector_store %arg5[%c0_12, %c0_13, %c0_14], %17 {strides = array<i32>} : memref<1x1x128xf32, #tpu.memory_space<vmem>>, vector<1x1x128xf32>,
      %cst_15 = arith.constant 0.000000e+00 : f32
      %19 = vector.broadcast %cst_15 : f32 to vector<1x1x128xf32>
      %c0_16 = arith.constant 0 : index
      %c0_17 = arith.constant 0 : index
      %c0_18 = arith.constant 0 : index
      %20 = vector.load %arg6[%c0_16, %c0_17, %c0_18] : memref<1x1x128xf32, #tpu.memory_space<vmem>>, vector<1x1x128xf32>
      tpu.vector_store %arg6[%c0_16, %c0_17, %c0_18], %19 {strides = array<i32>} : memref<1x1x128xf32, #tpu.memory_space<vmem>>, vector<1x1x128xf32>,
    } else {
    }
    %c0 = arith.constant 0 : index
    %c0_1 = arith.constant 0 : index
    %3 = vector.load %arg2[%c0, %c0_1] : memref<16x128xf32, #tpu.memory_space<vmem>>, vector<16x128xf32>
    %c0_2 = arith.constant 0 : index
    %c0_3 = arith.constant 0 : index
    %4 = vector.load %arg3[%c0_2, %c0_3] : memref<16x128xf32, #tpu.memory_space<vmem>>, vector<16x128xf32>
    %c1_i32 = arith.constant 1 : i32
    %5 = arith.muli %arg0, %c1_i32 : i32
    %6 = arith.addi %5, %arg1 : i32
    %c1_i32_4 = arith.constant 1 : i32
    %7 = arith.addi %6, %c1_i32_4 : i32
    %c16_i32 = arith.constant 16 : i32
    %8 = arith.muli %7, %c16_i32 : i32
    %c16_i32_5 = arith.constant 16 : i32
    %9 = arith.cmpi sgt, %8, %c16_i32_5 : i32
    %true = arith.constant true
    %10 = arith.xori %9, %true : i1
    %11 = arith.extui %10 : i1 to i32
    %c0_i32_6 = arith.constant 0 : i32
    %12 = arith.cmpi ne, %11, %c0_i32_6 : i32
    scf.if %12 {
      %c0_8 = arith.constant 0 : index
      %c0_9 = arith.constant 0 : index
      %c0_10 = arith.constant 0 : index
      %15 = vector.load %arg4[%c0_8, %c0_9, %c0_10] : memref<1x1x128xf32, #tpu.memory_space<vmem>>, vector<1x1x128xf32>
      %16 = arith.mulf %4, %3 : vector<16x128xf32>
      %cst = arith.constant dense<0.000000e+00> : vector<128xf32>
      %17 = vector.multi_reduction <add>, %16, %cst [0] : vector<16x128xf32> to vector<128xf32>
      %18 = vector.shape_cast %17 : vector<128xf32> to vector<1x128xf32>
      %19 = vector.shape_cast %18 : vector<1x128xf32> to vector<1x1x128xf32>
      %20 = arith.addf %15, %19 : vector<1x1x128xf32>
      %c0_11 = arith.constant 0 : index
      %c0_12 = arith.constant 0 : index
      %c0_13 = arith.constant 0 : index
      %21 = vector.load %arg4[%c0_11, %c0_12, %c0_13] : memref<1x1x128xf32, #tpu.memory_space<vmem>>, vector<1x1x128xf32>
      tpu.vector_store %arg4[%c0_11, %c0_12, %c0_13], %20 {strides = array<i32>} : memref<1x1x128xf32, #tpu.memory_space<vmem>>, vector<1x1x128xf32>,
      %c0_14 = arith.constant 0 : index
      %c0_15 = arith.constant 0 : index
      %c0_16 = arith.constant 0 : index
      %22 = vector.load %arg5[%c0_14, %c0_15, %c0_16] : memref<1x1x128xf32, #tpu.memory_space<vmem>>, vector<1x1x128xf32>
      %cst_17 = arith.constant dense<0.000000e+00> : vector<128xf32>
      %23 = vector.multi_reduction <add>, %4, %cst_17 [0] : vector<16x128xf32> to vector<128xf32>
      %24 = vector.shape_cast %23 : vector<128xf32> to vector<1x128xf32>
      %25 = vector.shape_cast %24 : vector<1x128xf32> to vector<1x1x128xf32>
      %26 = arith.addf %22, %25 : vector<1x1x128xf32>
      %c0_18 = arith.constant 0 : index
      %c0_19 = arith.constant 0 : index
      %c0_20 = arith.constant 0 : index
      %27 = vector.load %arg5[%c0_18, %c0_19, %c0_20] : memref<1x1x128xf32, #tpu.memory_space<vmem>>, vector<1x1x128xf32>
      tpu.vector_store %arg5[%c0_18, %c0_19, %c0_20], %26 {strides = array<i32>} : memref<1x1x128xf32, #tpu.memory_space<vmem>>, vector<1x1x128xf32>,
      %c0_21 = arith.constant 0 : index
      %c0_22 = arith.constant 0 : index
      %c0_23 = arith.constant 0 : index
      %28 = vector.load %arg6[%c0_21, %c0_22, %c0_23] : memref<1x1x128xf32, #tpu.memory_space<vmem>>, vector<1x1x128xf32>
      %cst_24 = arith.constant dense<0.000000e+00> : vector<128xf32>
      %29 = vector.multi_reduction <add>, %3, %cst_24 [0] : vector<16x128xf32> to vector<128xf32>
      %30 = vector.shape_cast %29 : vector<128xf32> to vector<1x128xf32>
      %31 = vector.shape_cast %30 : vector<1x128xf32> to vector<1x1x128xf32>
      %32 = arith.addf %28, %31 : vector<1x1x128xf32>
      %c0_25 = arith.constant 0 : index
      %c0_26 = arith.constant 0 : index
      %c0_27 = arith.constant 0 : index
      %33 = vector.load %arg6[%c0_25, %c0_26, %c0_27] : memref<1x1x128xf32, #tpu.memory_space<vmem>>, vector<1x1x128xf32>
      tpu.vector_store %arg6[%c0_25, %c0_26, %c0_27], %32 {strides = array<i32>} : memref<1x1x128xf32, #tpu.memory_space<vmem>>, vector<1x1x128xf32>,
    } else {
    }
    %13 = arith.extui %9 : i1 to i32
    %c0_i32_7 = arith.constant 0 : i32
    %14 = arith.cmpi ne, %13, %c0_i32_7 : i32
    scf.if %14 {
      %c16_i32_8 = arith.constant 16 : i32
      %15 = arith.muli %6, %c16_i32_8 : i32
      %16 = tpu.iota {dimensions = array<i32: 0>} : vector<16x128xi32>
      %17 = vector.broadcast %15 : i32 to vector<16x128xi32>
      %18 = arith.addi %17, %16 : vector<16x128xi32>
      %c16_i32_9 = arith.constant 16 : i32
      %19 = vector.broadcast %c16_i32_9 : i32 to vector<16x128xi32>
      %20 = arith.cmpi slt, %18, %19 : vector<16x128xi32>
      %cst = arith.constant 0.000000e+00 : f32
      %21 = vector.broadcast %cst : f32 to vector<16x128xf32>
      %22 = arith.select %20, %4, %21 : vector<16x128xi1>, vector<16x128xf32>
      %cst_10 = arith.constant 0.000000e+00 : f32
      %23 = vector.broadcast %cst_10 : f32 to vector<16x128xf32>
      %24 = arith.select %20, %3, %23 : vector<16x128xi1>, vector<16x128xf32>
      %c0_11 = arith.constant 0 : index
      %c0_12 = arith.constant 0 : index
      %c0_13 = arith.constant 0 : index
      %25 = vector.load %arg4[%c0_11, %c0_12, %c0_13] : memref<1x1x128xf32, #tpu.memory_space<vmem>>, vector<1x1x128xf32>
      %26 = arith.mulf %22, %24 : vector<16x128xf32>
      %cst_14 = arith.constant dense<0.000000e+00> : vector<128xf32>
      %27 = vector.multi_reduction <add>, %26, %cst_14 [0] : vector<16x128xf32> to vector<128xf32>
      %28 = vector.shape_cast %27 : vector<128xf32> to vector<1x128xf32>
      %29 = vector.shape_cast %28 : vector<1x128xf32> to vector<1x1x128xf32>
      %30 = arith.addf %25, %29 : vector<1x1x128xf32>
      %c0_15 = arith.constant 0 : index
      %c0_16 = arith.constant 0 : index
      %c0_17 = arith.constant 0 : index
      %31 = vector.load %arg4[%c0_15, %c0_16, %c0_17] : memref<1x1x128xf32, #tpu.memory_space<vmem>>, vector<1x1x128xf32>
      tpu.vector_store %arg4[%c0_15, %c0_16, %c0_17], %30 {strides = array<i32>} : memref<1x1x128xf32, #tpu.memory_space<vmem>>, vector<1x1x128xf32>,
      %c0_18 = arith.constant 0 : index
      %c0_19 = arith.constant 0 : index
      %c0_20 = arith.constant 0 : index
      %32 = vector.load %arg5[%c0_18, %c0_19, %c0_20] : memref<1x1x128xf32, #tpu.memory_space<vmem>>, vector<1x1x128xf32>
      %cst_21 = arith.constant dense<0.000000e+00> : vector<128xf32>
      %33 = vector.multi_reduction <add>, %22, %cst_21 [0] : vector<16x128xf32> to vector<128xf32>
      %34 = vector.shape_cast %33 : vector<128xf32> to vector<1x128xf32>
      %35 = vector.shape_cast %34 : vector<1x128xf32> to vector<1x1x128xf32>
      %36 = arith.addf %32, %35 : vector<1x1x128xf32>
      %c0_22 = arith.constant 0 : index
      %c0_23 = arith.constant 0 : index
      %c0_24 = arith.constant 0 : index
      %37 = vector.load %arg5[%c0_22, %c0_23, %c0_24] : memref<1x1x128xf32, #tpu.memory_space<vmem>>, vector<1x1x128xf32>
      tpu.vector_store %arg5[%c0_22, %c0_23, %c0_24], %36 {strides = array<i32>} : memref<1x1x128xf32, #tpu.memory_space<vmem>>, vector<1x1x128xf32>,
      %c0_25 = arith.constant 0 : index
      %c0_26 = arith.constant 0 : index
      %c0_27 = arith.constant 0 : index
      %38 = vector.load %arg6[%c0_25, %c0_26, %c0_27] : memref<1x1x128xf32, #tpu.memory_space<vmem>>, vector<1x1x128xf32>
      %cst_28 = arith.constant dense<0.000000e+00> : vector<128xf32>
      %39 = vector.multi_reduction <add>, %24, %cst_28 [0] : vector<16x128xf32> to vector<128xf32>
      %40 = vector.shape_cast %39 : vector<128xf32> to vector<1x128xf32>
      %41 = vector.shape_cast %40 : vector<1x128xf32> to vector<1x1x128xf32>
      %42 = arith.addf %38, %41 : vector<1x1x128xf32>
      %c0_29 = arith.constant 0 : index
      %c0_30 = arith.constant 0 : index
      %c0_31 = arith.constant 0 : index
      %43 = vector.load %arg6[%c0_29, %c0_30, %c0_31] : memref<1x1x128xf32, #tpu.memory_space<vmem>>, vector<1x1x128xf32>
      tpu.vector_store %arg6[%c0_29, %c0_30, %c0_31], %42 {strides = array<i32>} : memref<1x1x128xf32, #tpu.memory_space<vmem>>, vector<1x1x128xf32>,
    } else {
    }
    return
  }
  func.func @transform_0(%arg0: i32, %arg1: i32) -> (i32, i32) {
    %c1_i32 = arith.constant 1 : i32
    %0 = arith.muli %arg0, %c1_i32 : i32
    %1 = arith.addi %0, %arg1 : i32
    %c0_i32 = arith.constant 0 : i32
    %2 = arith.minsi %1, %c0_i32 : i32
    %c0_i32_0 = arith.constant 0 : i32
    %c0_i32_1 = arith.constant 0 : i32
    return %2, %c0_i32_0 : i32, i32
  }
  func.func @transform_1(%arg0: i32, %arg1: i32) -> (i32, i32) {
    %c1_i32 = arith.constant 1 : i32
    %0 = arith.muli %arg0, %c1_i32 : i32
    %1 = arith.addi %0, %arg1 : i32
    %c0_i32 = arith.constant 0 : i32
    %2 = arith.minsi %1, %c0_i32 : i32
    %c0_i32_0 = arith.constant 0 : i32
    %c0_i32_1 = arith.constant 0 : i32
    return %2, %c0_i32_0 : i32, i32
  }
  func.func @transform_2(%arg0: i32, %arg1: i32) -> (i32, i32, i32) {
    %c0_i32 = arith.constant 0 : i32
    %c0_i32_0 = arith.constant 0 : i32
    %c0_i32_1 = arith.constant 0 : i32
    return %arg0, %c0_i32, %c0_i32_0 : i32, i32, i32
  }
  func.func @transform_3(%arg0: i32, %arg1: i32) -> (i32, i32, i32) {
    %c0_i32 = arith.constant 0 : i32
    %c0_i32_0 = arith.constant 0 : i32
    %c0_i32_1 = arith.constant 0 : i32
    return %arg0, %c0_i32, %c0_i32_0 : i32, i32, i32
  }
  func.func @transform_4(%arg0: i32, %arg1: i32) -> (i32, i32, i32) {
    %c0_i32 = arith.constant 0 : i32
    %c0_i32_0 = arith.constant 0 : i32
    %c0_i32_1 = arith.constant 0 : i32
    return %arg0, %c0_i32, %c0_i32_0 : i32, i32, i32
  }
}

</mosaic_0001>

<bundles_post_ra>
// kernel: tpu_custom_call.1
= control target key start
LH: loop header
LB: loop body
LE: loop exit
PB: predicated region body
PF: predicated region fallthrough
CT: control target
= control target key end

     0   :  { %s1243_s0 = inlined_call_operand.hbm [shape: f32[16,128], index: 0, kind: input, shape index: {}]   ;;  %s1244_s1 = inlined_call_operand.hbm [shape: f32[16,128], index: 1, kind: input, shape index: {}]   ;;  %s1245_s2 = inlined_call_operand.hbm [shape: f32[2,1,128], index: 2, kind: output, shape index: {0}]   ;;  %s1246_s3 = inlined_call_operand.hbm [shape: f32[2,1,128], index: 3, kind: output, shape index: {1}]   ;;  %s1247_s4 = inlined_call_operand.hbm [shape: f32[2,1,128], index: 4, kind: output, shape index: {2}]  }
   0x1   :  { %1249 = sst [smem:[#allocation15_spill]] %s1243_s0 }
   0x2   :  { %1250 = sst [smem:[#allocation16_spill]] %s1244_s1 }
   0x3   :  { %10 = vsyncpa [#allocation3], 0 }
   0x4   :  { %12 = vsyncpa [#allocation3 + $0x1], 0 }
   0x5   :  { %13 = vsyncpa [#allocation6], 0 }
   0x6   :  { %15 = vsyncpa [#allocation6 + $0x1], 0 }
   0x7   :  { %16 = vsyncpa [#allocation4], 0 }
   0x8   :  { %18 = vsyncpa [#allocation4 + $0x1], 0 }
   0x9   :  { %19 = vsyncpa [#allocation9], 0 }
   0xa   :  { %21 = vsyncpa [#allocation9 + $0x1], 0  ;;  %s995_s15 = smov 0   ;;  %s997_s16 = smov 0  }
   0xb   :  { %s999_s17 = smov 0   ;;  %s1001_s18 = smov 0  }
   0xc   :  { %s1003_s19 = smov 0   ;;  %s1005_s20 = smov 0  }
   0xd   :  { %s1007_s21 = smov 0   ;;  %s1009_s22 = smov 0  }
   0xe LB: > { %s1034_s23 = sadd.s32 4294967295, %s963_s22   ;;  %s1248_s24 = sadd.s32 4294967294, %s963_s22   ;;  %s963_s22 = sphi %s1009_s22, %s27_s22   ;;  %s959_s21 = sphi %s1007_s21, %s1265_s21   ;;  %s955_s20 = sphi %s1005_s20, %s1264_s20   ;;  %s951_s19 = sphi %s1003_s19, %s1233_s19   ;;  %s947_s18 = sphi %s1001_s18, %s1263_s18   ;;  %s943_s17 = sphi %s999_s17, %s1262_s17   ;;  %s939_s16 = sphi %s997_s16, %s1261_s16   ;;  %s935_s15 = sphi %s995_s15, %s1260_s15  }
   0xf   : > { %s39_s25 = sadd.s32 1, %s959_s21  ;;  %p932_p1 = scmp.ne.s32.totalorder %s951_s19, 0 }
  0x10   : > { %p41_p0 = scmp.ge.s32.totalorder %s39_s25, 2  ;;  %p60_p2 = scmp.eq.s32.totalorder %s963_s22, 0 }
  0x11   : > { %p65_p3 = scmp.ne.s32.totalorder %s951_s19, %s947_s18  ;;  %p66_p5 = scmp.eq.s32.totalorder %s1034_s23, 0 }
  0x12   : > { %s1267_s25 = smov (%p41_p0, %s39_s25), 0  ;;  %p1043_p4 = por %p932_p1, %p60_p2 }
  0x13   : > { %p1048_p6 = por %p66_p5, %p65_p3  ;;  %s107_s28 = ssub.s32 %s959_s21, %s1267_s25 }
  0x14   : > { %p108_p7 = scmp.eq.s32.totalorder %s107_s28, 0  ;;  %s110_s29 = sadd.s32 1, %s943_s17 }
  0x15   : > { %p120_p8 = scmp.ne.s32.totalorder %s943_s17, %s939_s16  ;;  %p121_p9 = scmp.eq.s32.totalorder %s1034_s23, 1 }
  0x16   : > { %s1056_s30 = scalar_select %p108_p7, %s943_s17, %s110_s29  }
  0x17   : > { %p126_p10 = scmp.ne.s32.totalorder %s939_s16, %s935_s15  ;;  %p127_p11 = scmp.eq.s32.totalorder %s1248_s24, 1 }
  0x18   : > { %p1065_p12 = por %p121_p9, %p120_p8  ;;  %p612_p13 = scmp.ge.s32.totalorder %s963_s22, 2 }
  0x19   : > { %p1070_p0 = por %p127_p11, %p126_p10  ;;  %p659_p1 = scmp.lt.s32.totalorder %s963_s22, 2 }
  0x1a   : > { %s1255_s0 = sld [smem:[#allocation15_spill]]  ;;  %s965_s10 = smov [#allocation2]  }
  0x1b   : > { %s214_s11 = sshll.u32 %s965_s10, 4  ;;  %p1080_p2 = pnand %p659_p1, %p1043_p4  ;;  %s215_s11 = int_to_ptr.vmem [resolvable:$true] %s214_s11 }
  0x1c   : > { %p619_p3 = scmp.ge.s32.totalorder %s963_s22, 1  ;;  %p247_p5 = scmp.lt.s32.totalorder %s963_s22, 3 }
  0x1d   : > { %p740_p8 = pneg %p1080_p2 }
  0x20   : > { %s212_s9 = sshll.u32 %s1255_s0, 4  ;;  %s743_s28 = scalar_lea.hbm %s1255_s0, 16  ;;  %s213_s9 = int_to_ptr.hbm [resolvable:$true] %s212_s9 }
  0x21   : > { %s736_s13 = sshra.s32 %s213_s9, 4  ;;  %s737_s13 = int_to_ptr.hbm [resolvable:$true] %s736_s13 }
  0x22   : > { %s738_s14 = scalar_lea.hbm %s737_s13, 16 }
  0x23   : > { %p739_p7 = scmp.ne.s32.totalorder %s737_s13, %s738_s14  ;;  %p745_p4 = scmp.lt.s32.totalorder %s743_s28, %s738_s14 }
  0x25   : > { %p741_p9 = pnand %p740_p8, %p739_p7 }
  0x27   : > { %p742_p10 = pneg %p741_p9 }
  0x29   : > { %p747_p11 = pnand %p745_p4, %p742_p10 }
  0x2b   : > { %750 = shalt.err (!%p747_p11)
}
  0x2c   : > { %s966_s29 = smov 128   ;;  %s967_s7 = smov 8  }
  0x2d   : > { %645 = dma.hbm_to_vmem [thread:$0]  (!%p1080_p2), %s213_s9, 256, %s215_s11, [#allocation3], %s966_s29, %s966_s29, %s967_s7  }
  0x2e   : > { %p1100_p1 = pnand %p619_p3, %p247_p5  ;;  %s1258_s1 = sld [smem:[#allocation16_spill]] }
  0x2f   : > { %s968_s18 = smov [#allocation5]  }
  0x30   : > { %s239_s26 = sshll.u32 %s968_s18, 4  ;;  %s240_s26 = int_to_ptr.vmem [resolvable:$true] %s239_s26 }
  0x34   : > { %s237_s14 = sshll.u32 %s1258_s1, 4  ;;  %s773_s0 = scalar_lea.hbm %s1258_s1, 16  ;;  %s238_s14 = int_to_ptr.hbm [resolvable:$true] %s237_s14 }
  0x35   : > { %s766_s28 = sshra.s32 %s238_s14, 4  ;;  %s767_s28 = int_to_ptr.hbm [resolvable:$true] %s766_s28 }
  0x36   : > { %s768_s24 = scalar_lea.hbm %s767_s28, 16 }
  0x37   : > { %p769_p7 = scmp.ne.s32.totalorder %s767_s28, %s768_s24  ;;  %p775_p3 = scmp.lt.s32.totalorder %s773_s0, %s768_s24 }
  0x39   : > { %p771_p9 = pnand %p769_p7, %p740_p8 }
  0x3b   : > { %p772_p10 = pneg %p771_p9 }
  0x3d   : > { %p777_p5 = pnand %p775_p3, %p772_p10 }
  0x3f   : > { %780 = shalt.err (!%p777_p5)
}
  0x40   : > { %648 = dma.hbm_to_vmem [thread:$0]  (!%p1080_p2), %s238_s14, 256, %s240_s26, [#allocation6], %s966_s29, %s966_s29, %s967_s7  }
  0x41   : > { %251 = sbr.rel (%p1100_p1) target bundleno = 179 (0xb3), region = 28  ;;  %s253_s10 = sand.u32 (!%p1100_p1), 1, %s951_s19  }
  0x42   : > { %s620_s13 = sshll.u32 (!%p1100_p1), %s253_s10, 4  ;;  %s254_s18 = scalar_lea.sflag (!%p1100_p1), [#allocation3], %s253_s10 }
  0x43   : > { %s257_s28 = scalar_lea.vmem (!%p1100_p1), [#allocation2], %s620_s13 }
  0x46   : > { %917 = dma.done.wait (%p1048_p6), %s254_s18, 256  }
  0x47   : > { %919 = vsyncadd (%p1048_p6), %s254_s18, 4294967040  ;;  %s264_s0 = scalar_lea.sflag [#allocation6], %s253_s10  ;;  %s267_s24 = scalar_lea.vmem [#allocation5], %s620_s13 }
  0x48   : > { %921 = dma.done.wait (%p1048_p6), %s264_s0, 256  }
  0x49   : > { %923 = vsyncadd (%p1048_p6), %s264_s0, 4294967040  ;;  %s1127_s12 = sand.u32 1, %s939_s16   ;;  %s630_s29 = sshll.u32 %s955_s20, 4  ;;  %v969_v0 = vmov 0.0   ;;  %v320_v1 = vld [vmem:[%s257_s28] sm:$0xff]  ;;  %v321_v2 = vld [vmem:[%s257_s28 + $0x8] sm:$0xff] }
  0x4a   : > { %s1131_s7 = scalar_lea.vmem [#allocation7], %s1127_s12  ;;  %s1136_s8 = sadd.s32 16, %s630_s29  ;;  %v322_v3 = vld [vmem:[%s267_s24] sm:$0xff]  ;;  %v323_v4 = vld [vmem:[%s267_s24 + $0x8] sm:$0xff] }
  0x4b   : > { %317 = vst [vmem:[%s1131_s7] sm:$0x1] %v969_v0  ;;  %s1139_s14 = scalar_lea.vmem [#allocation8], %s1127_s12  ;;  %s1143_s27 = scalar_lea.vmem [#allocation10], %s1127_s12 }
  0x4c   : > { %318 = vst [vmem:[%s1139_s14] sm:$0x1] %v969_v0  ;;  %p623_p6 = scmp.gt.s32.totalorder %s1136_s8, 16 }
  0x4d   : > { %319 = vst [vmem:[%s1143_s27] sm:$0x1] %v969_v0 }
  0x4e   : > { %331 = sbr.rel (%p623_p6) target bundleno = 102 (0x66), region = 44 }
  0x53   : > { %v333_v5 = vmul.f32 %v322_v3, %v320_v1  ;;  %v334_v6 = vmul.f32 %v323_v4, %v321_v2  ;;  %v345_v7 = vadd.f32 %v323_v4, %v322_v3  ;;  %v355_v8 = vadd.f32 %v321_v2, %v320_v1  ;;  %v344_v24 = vld [vmem:[%s1139_s14] sm:$0x1] }
  0x54   : > { %v354_v25 = vld [vmem:[%s1143_s27] sm:$0x1] }
  0x55   : > { %v335_v9 = vadd.f32 %v334_v6, %v333_v5  ;;  %v346_v10 = vrot.slane %v345_v7, 4  ;;  %v356_v11 = vrot.slane %v355_v8, 4  ;;  %v332_v29 = vld [vmem:[%s1131_s7] sm:$0x1] }
  0x57   : > { %v336_v12 = vrot.slane %v335_v9, 4  ;;  %v347_v13 = vadd.f32 %v346_v10, %v345_v7  ;;  %v357_v14 = vadd.f32 %v356_v11, %v355_v8 }
  0x59   : > { %v337_v15 = vadd.f32 %v336_v12, %v335_v9  ;;  %v348_v16 = vrot.slane %v347_v13, 2  ;;  %v358_v17 = vrot.slane %v357_v14, 2 }
  0x5b   : > { %v338_v18 = vrot.slane %v337_v15, 2  ;;  %v349_v19 = vadd.f32 %v348_v16, %v347_v13  ;;  %v359_v20 = vadd.f32 %v358_v17, %v357_v14 }
  0x5d   : > { %v339_v21 = vadd.f32 %v338_v18, %v337_v15  ;;  %v350_v22 = vrot.slane %v349_v19, 1  ;;  %v360_v23 = vrot.slane %v359_v20, 1 }
  0x5f   : > { %v340_v26 = vrot.slane %v339_v21, 1  ;;  %v351_v27 = vadd.f32 %v350_v22, %v349_v19  ;;  %v361_v28 = vadd.f32 %v360_v23, %v359_v20 }
  0x61   : > { %v341_v30 = vadd.f32 %v340_v26, %v339_v21  ;;  %v352_v31 = vadd.f32 %v351_v27, %v344_v24  ;;  %v362_v32 = vadd.f32 %v361_v28, %v354_v25 }
  0x63   : > { %v342_v33 = vadd.f32 %v341_v30, %v332_v29  ;;  %353 = vst [vmem:[%s1139_s14] sm:$0x1] %v352_v31 }
  0x64   : > { %363 = vst [vmem:[%s1143_s27] sm:$0x1] %v362_v32 }
  0x65   : > { %343 = vst [vmem:[%s1131_s7] sm:$0x1] %v342_v33 }
  0x66 PF: > { %p624_p2 = scmp.le.s32.totalorder %s1136_s8, 16 }
  0x68   : > { %366 = sbr.rel (%p624_p2) target bundleno = 138 (0x8a), region = 48 }
  0x6d   : > { %v368_v34 = vlaneseq  ;;  %v371_v35 = vstv %s630_s29  ;;  %v392_v63 = vld [vmem:[%s1139_s14] sm:$0x1] }
  0x6e   : > { %v402_v0 = vld [vmem:[%s1143_s27] sm:$0x1] }
  0x6f   : > { %v369_v36 = vshrl.u32 %v368_v34, 7 }
  0x71   : > { %v370_v37 = vadd.s32 8, %v369_v36  ;;  %v372_v38 = vadd.s32 %v371_v35, %v369_v36 }
  0x73   : > { %v373_v39 = vadd.s32 %v371_v35, %v370_v37  ;;  %vm374_vm0 = vcmp.lt.s32.totalorder %v372_v38, 16 }
  0x74   : > { %v376_v40 = vsel %vm374_vm0, %v322_v3, 0.0  ;;  %v378_v41 = vsel %vm374_vm0, %v320_v1, 0.0 }
  0x75   : > { %vm375_vm1 = vcmp.lt.s32.totalorder %v373_v39, 16  ;;  %v381_v42 = vmul.f32 %v378_v41, %v376_v40 }
  0x76   : > { %v377_v43 = vsel %vm375_vm1, %v323_v4, 0.0  ;;  %v379_v44 = vsel %vm375_vm1, %v321_v2, 0.0  ;;  %v380_v4 = vld [vmem:[%s1131_s7] sm:$0x1] }
  0x77   : > { %v382_v45 = vmul.f32 %v379_v44, %v377_v43  ;;  %v393_v46 = vadd.f32 %v377_v43, %v376_v40  ;;  %v403_v47 = vadd.f32 %v379_v44, %v378_v41 }
  0x79   : > { %v383_v48 = vadd.f32 %v382_v45, %v381_v42  ;;  %v394_v49 = vrot.slane %v393_v46, 4  ;;  %v404_v50 = vrot.slane %v403_v47, 4 }
  0x7b   : > { %v384_v51 = vrot.slane %v383_v48, 4  ;;  %v395_v52 = vadd.f32 %v394_v49, %v393_v46  ;;  %v405_v53 = vadd.f32 %v404_v50, %v403_v47 }
  0x7d   : > { %v385_v54 = vadd.f32 %v384_v51, %v383_v48  ;;  %v396_v55 = vrot.slane %v395_v52, 2  ;;  %v406_v56 = vrot.slane %v405_v53, 2 }
  0x7f   : > { %v386_v57 = vrot.slane %v385_v54, 2  ;;  %v397_v58 = vadd.f32 %v396_v55, %v395_v52  ;;  %v407_v59 = vadd.f32 %v406_v56, %v405_v53 }
  0x81   : > { %v387_v60 = vadd.f32 %v386_v57, %v385_v54  ;;  %v398_v61 = vrot.slane %v397_v58, 1  ;;  %v408_v62 = vrot.slane %v407_v59, 1 }
  0x83   : > { %v388_v1 = vrot.slane %v387_v60, 1  ;;  %v399_v2 = vadd.f32 %v398_v61, %v397_v58  ;;  %v409_v3 = vadd.f32 %v408_v62, %v407_v59 }
  0x85   : > { %v389_v5 = vadd.f32 %v388_v1, %v387_v60  ;;  %v400_v6 = vadd.f32 %v399_v2, %v392_v63  ;;  %v410_v7 = vadd.f32 %v409_v3, %v402_v0 }
  0x87   : > { %v390_v8 = vadd.f32 %v389_v5, %v380_v4  ;;  %401 = vst [vmem:[%s1139_s14] sm:$0x1] %v400_v6 }
  0x88   : > { %411 = vst [vmem:[%s1143_s27] sm:$0x1] %v410_v7 }
  0x89   : > { %391 = vst [vmem:[%s1131_s7] sm:$0x1] %v390_v8 }
  0x8a PF: > { %s416_s26 = sand.u32 1, %s1034_s23   ;;  %s442_s10 = scalar_lea.hbm %s1246_s3, %s955_s20 }
  0x8b   : > { %s444_s13 = sshll.u32 %s1139_s14, 4  ;;  %s446_s18 = sshll.u32 %s442_s10, 4  ;;  %s445_s13 = int_to_ptr.vmem [resolvable:$true] %s444_s13  ;;  %s447_s18 = int_to_ptr.hbm [resolvable:$true] %s446_s18 }
  0x8c   : > { %s1168_s28 = scalar_lea.sflag [#allocation9], %s416_s26  ;;  %s810_s0 = sshra.s32 %s447_s18, 4  ;;  %s811_s0 = int_to_ptr.hbm [resolvable:$true] %s810_s0 }
  0x8d   : > { %s812_s24 = scalar_lea.hbm %s811_s0, 1  ;;  %s816_s23 = scalar_lea.hbm %s1246_s3, 2 }
  0x8e   : > { %p813_p8 = scmp.ne.s32.totalorder %s811_s0, %s812_s24  ;;  %p817_p1 = scmp.lt.s32.totalorder %s811_s0, %s1246_s3 }
  0x8f   : > { %p818_p7 = scmp.lt.s32.totalorder %s816_s23, %s812_s24 }
  0x90   : > { %p814_p4 = pnand %p813_p8, %p1065_p12 }
  0x91   : > { %p819_p9 = por %p818_p7, %p817_p1 }
  0x92   : > { %p815_p11 = pneg %p814_p4 }
  0x94   : > { %p820_p10 = pnand %p819_p9, %p815_p11 }
  0x96   : > { %823 = shalt.err (!%p820_p10)
}
  0x97   : > { %637 = dma.vmem_to_hbm [thread:$0]  (%p1065_p12), %s445_s13, 16, %s447_s18, %s1168_s28  }
  0x98   : > { %s429_s11 = scalar_lea.hbm %s1245_s2, %s955_s20  ;;  %s431_s10 = sshll.u32 %s1131_s7, 4  ;;  %s432_s10 = int_to_ptr.vmem [resolvable:$true] %s431_s10 }
  0x99   : > { %s433_s1 = sshll.u32 %s429_s11, 4  ;;  %s455_s29 = scalar_lea.hbm %s1247_s4, %s955_s20  ;;  %s434_s1 = int_to_ptr.hbm [resolvable:$true] %s433_s1 }
  0x9a   : > { %s413_s8 = scalar_lea.sflag [#allocation4], %s1127_s12  ;;  %s838_s23 = sshra.s32 %s434_s1, 4  ;;  %s839_s23 = int_to_ptr.hbm [resolvable:$true] %s838_s23 }
  0x9b   : > { %s840_s9 = scalar_lea.hbm %s839_s23, 1  ;;  %s844_s14 = scalar_lea.hbm %s1245_s2, 2 }
  0x9c   : > { %p841_p3 = scmp.ne.s32.totalorder %s839_s23, %s840_s9  ;;  %p845_p2 = scmp.lt.s32.totalorder %s839_s23, %s1245_s2 }
  0x9d   : > { %p846_p8 = scmp.lt.s32.totalorder %s844_s14, %s840_s9 }
  0x9e   : > { %p842_p5 = pnand %p841_p3, %p1065_p12 }
  0x9f   : > { %p847_p4 = por %p846_p8, %p845_p2 }
  0xa0   : > { %p843_p6 = pneg %p842_p5 }
  0xa2   : > { %p848_p11 = pnand %p847_p4, %p843_p6 }
  0xa4   : > { %851 = shalt.err (!%p848_p11)
}
  0xa5   : > { %636 = dma.vmem_to_hbm [thread:$0]  (%p1065_p12), %s432_s10, 16, %s434_s1, %s413_s8  }
  0xa6   : > { %s457_s20 = sshll.u32 %s1143_s27, 4  ;;  %s459_s12 = sshll.u32 %s455_s29, 4  ;;  %s458_s20 = int_to_ptr.vmem [resolvable:$true] %s457_s20  ;;  %s460_s12 = int_to_ptr.hbm [resolvable:$true] %s459_s12 }
  0xa7   : > { %s866_s11 = sshra.s32 %s460_s12, 4  ;;  %s872_s9 = scalar_lea.hbm %s1247_s4, 2  ;;  %s867_s11 = int_to_ptr.hbm [resolvable:$true] %s866_s11 }
  0xa8   : > { %s868_s0 = scalar_lea.hbm %s867_s11, 1  ;;  %p873_p10 = scmp.lt.s32.totalorder %s867_s11, %s1247_s4 }
  0xa9   : > { %p869_p1 = scmp.ne.s32.totalorder %s867_s11, %s868_s0  ;;  %p874_p3 = scmp.lt.s32.totalorder %s872_s9, %s868_s0 }
  0xab   : > { %p870_p7 = pnand %p869_p1, %p1065_p12  ;;  %p875_p5 = por %p874_p3, %p873_p10 }
  0xad   : > { %p871_p9 = pneg %p870_p7 }
  0xaf   : > { %p876_p6 = pnand %p875_p5, %p871_p9 }
  0xb1   : > { %879 = shalt.err (!%p876_p6)
}
  0xb2   : > { %638 = dma.vmem_to_hbm [thread:$0]  (%p1065_p12), %s458_s20, 16, %s460_s12, %s1168_s28  }
  0xb3 PF: > { %s471_s27 = sand.u32 1, %s935_s15   ;;  %p650_p2 = pnand %p612_p13, %p1070_p0 }
  0xb4   : > { %s472_s10 = scalar_lea.sflag [#allocation4], %s471_s27 }
  0xb5   : > { %p651_p8 = pneg %p650_p2 }
  0xb7   : > { %925 = dma.done.wait (%p651_p8), %s472_s10, 16  }
  0xb8   : > { %927 = vsyncadd (%p651_p8), %s472_s10, 4294967280  ;;  %s1259_s1 = sadd.s32 4294967294, %s963_s22  }
  0xb9   : > { %s480_s29 = sand.u32 1, %s1259_s1  }
  0xba   : > { %s481_s8 = scalar_lea.sflag [#allocation9], %s480_s29 }
  0xbb   : > { %929 = dma.done.wait (%p651_p8), %s481_s8, 32  }
  0xbc   : > { %931 = vsyncadd (%p651_p8), %s481_s8, 4294967264  ;;  %s27_s22 = sadd.s32 1, %s963_s22   ;;  %s1260_s15 = smov %s939_s16 }
  0xbd   : > { %p24_p12 = scmp.ge.s32.totalorder %s27_s22, 4   ;;  %s1261_s16 = smov %s943_s17 }
  0xbe   : > { %s1262_s17 = smov %s1056_s30  ;;  %s1263_s18 = smov %s951_s19 }
  0xbf   : > { %s1233_s19 = smov 0   ;;  %s1264_s20 = smov %s959_s21 }
  0xc0   : > { %s1265_s21 = smov %s1267_s25  ;;  %26 = sbr.rel (!%p24_p12) target bundleno = 14 (0xe), region = 130 }
  0xc5   :  { %495 = vsyncpa [#allocation3], 1 }
  0xc6   :  { %497 = vsyncpa [#allocation3 + $0x1], 1 }
  0xc7   :  { %498 = vsyncpa [#allocation6], 1 }
  0xc8   :  { %500 = vsyncpa [#allocation6 + $0x1], 1 }
  0xc9   :  { %501 = vsyncpa [#allocation4], 1 }
  0xca   :  { %503 = vsyncpa [#allocation4 + $0x1], 1 }
  0xcb   :  { %504 = vsyncpa [#allocation9], 1 }
  0xcc   :  { %506 = vsyncpa [#allocation9 + $0x1], 1 }

</bundles_post_ra>
